<compile_context>
chip_gen: v6e
topology: v6e:2x2x1
jax: 0.10.0
libtpu: 0.0.40
codegen_flags: <defaults>
</compile_context>

<pallas_src>
import functools

import jax
import jax.numpy as jnp
from jax.experimental import pallas as pl
from jax.experimental.pallas import tpu as pltpu


def dnn_kernel(x_ref, w1_ref, b1_ref, w2_ref, b2_ref,
               w3_ref, b3_ref, w4_ref, b4_ref, o_ref):
    x = x_ref[...]                                 # (tm, 3)   f32
    w1 = w1_ref[...]                               # (3, 128)  f32, BN1 folded

    # Layer 1: Linear(3,128)+BN1+ReLU on the VPU.
    # A K=3 matmul costs the same MXU pushes as a full layer for ~1% of the
    # useful FLOPs, so do it as 3 broadcast FMAs instead.
    h = (x[:, 0:1] * w1[0:1, :]
         + x[:, 1:2] * w1[1:2, :]
         + x[:, 2:3] * w1[2:3, :])
    h = jnp.maximum(h + b1_ref[...], 0.0)
    # Dropout(p=0.5): identity in eval mode.

    # Layer 2: Linear(128,256)+BN2+ReLU on the MXU, bf16 inputs / f32 accumulate.
    h = jnp.dot(h.astype(jnp.bfloat16), w2_ref[...],
                preferred_element_type=jnp.float32)
    h = jnp.maximum(h + b2_ref[...], 0.0)

    # Layer 3: Linear(256,128)+BN3+ReLU on the MXU, bf16 inputs / f32 accumulate.
    h = jnp.dot(h.astype(jnp.bfloat16), w3_ref[...],
                preferred_element_type=jnp.float32)
    h = jnp.maximum(h + b3_ref[...], 0.0)

    # Layer 4: Linear(128,1) as VPU broadcast-mul + XLU lane reduction
    # (an N_out=1 matmul would burn the same MXU pushes as a 128-wide layer).
    o_ref[...] = (jnp.sum(h * w4_ref[...], axis=-1, keepdims=True)
                  + b4_ref[...])


def _round_up(v, m):
    return ((v + m - 1) // m) * m


@functools.partial(jax.jit, static_argnames=("tile_m",))
def dnn_forward(x, params, *, tile_m=1024):
    """x: (N, 3) float32.  params: dict of BN-folded f32 weights/biases."""
    n = x.shape[0]
    # Tile the batch; sublane granularity is 8 rows.  Clamp for small N.
    tm = min(_round_up(tile_m, 8), _round_up(max(n, 1), 8))
    n_pad = _round_up(n, tm)
    if n_pad != n:
        x = jnp.pad(x, ((0, n_pad - n), (0, 0)))

    # Pre-cast the MXU weights to bf16 once (outside the kernel / grid loop).
    w2 = params["w2"].astype(jnp.bfloat16)
    w3 = params["w3"].astype(jnp.bfloat16)

    args = (x,
            params["w1"], params["b1"],
            w2, params["b2"],
            w3, params["b3"],
            params["w4"], params["b4"])

    def resident_spec(arr):
        # Constant index map -> block stays VMEM-resident, DMA'd once.
        # Default-arg capture avoids the late-binding closure bug.
        nd = arr.ndim
        return pl.BlockSpec(arr.shape, lambda i, _nd=nd: (0,) * _nd)

    in_specs = [pl.BlockSpec((tm, 3), lambda i: (i, 0))]        # streamed x
    in_specs += [resident_spec(a) for a in args[1:]]            # weights/biases
    out_spec = pl.BlockSpec((tm, 1), lambda i: (i, 0))          # streamed out

    out = pl.pallas_call(
        dnn_kernel,
        grid=(n_pad // tm,),
        in_specs=in_specs,
        out_specs=out_spec,
        out_shape=jax.ShapeDtypeStruct((n_pad, 1), jnp.float32),
        compiler_params=pltpu.CompilerParams(
            # Parallel batch axis: Mosaic can shard steps across v7x's 2 TCs.
            dimension_semantics=("parallel",),
            # Generous but safe on all generations; per-step use is a few MiB
            # (double-buffered x/out tiles + ~0.2 MiB resident weights).
            vmem_limit_bytes=32 * 1024 * 1024,
        ),
    )(*args)
    return out[:n]


def init_params(key):
    """Deterministic synthetic parameters matching the PyTorch module shapes."""
    dims = [(3, 128), (128, 256), (256, 128), (128, 1)]
    ks = jax.random.split(key, 16)
    params = {}
    ki = 0
    for li, (fan_in, fan_out) in enumerate(dims, start=1):
        bound = 1.0 / jnp.sqrt(fan_in)
        # PyTorch Linear weight is (out, in); keep (in, out) for x @ W.
        w = jax.random.uniform(ks[ki], (fan_in, fan_out), jnp.float32,
                               -bound, bound); ki += 1
        b = jax.random.uniform(ks[ki], (fan_out,), jnp.float32,
                               -bound, bound); ki += 1
        if li < 4:
            # BatchNorm1d(fan_out) parameters / running stats, eval mode.
            gamma = 1.0 + 0.1 * jax.random.normal(ks[ki], (fan_out,),
                                                  jnp.float32); ki += 1
            beta = 0.1 * jax.random.normal(ks[ki], (fan_out,),
                                           jnp.float32); ki += 1
            running_mean = jnp.zeros((fan_out,), jnp.float32)
            running_var = jnp.ones((fan_out,), jnp.float32)
            eps = 1e-5
            scale = gamma / jnp.sqrt(running_var + eps)
            shift = beta - running_mean * scale
            # Fold BN into the linear layer: y = (xW + b)*scale + shift
            w = w * scale[None, :]
            b = b * scale + shift
            params[f"w{li}"] = w
            params[f"b{li}"] = b.reshape(1, fan_out)
        else:
            # Final layer stored as a row vector for the VPU/XLU row-dot.
            params["w4"] = w.reshape(1, fan_in)      # (1, 128)
            params["b4"] = b.reshape(1, 1)           # (1, 1)
    return params


if __name__ == "__main__":
    key = jax.random.PRNGKey(0)
    pkey, xkey = jax.random.split(key)
    params = init_params(pkey)

    batch = 13          # non-multiple of 8: exercises the padding path
    x = jax.random.normal(xkey, (batch, 3), jnp.float32)

    out = dnn_forward(x, params)
    jax.block_until_ready(out)
    assert out.shape == (batch, 1)

    # Pure-JAX reference with matching bf16-input / f32-accumulate matmuls.
    h = jnp.maximum(x @ params["w1"] + params["b1"], 0.0)
    h = jnp.maximum(
        jnp.dot(h.astype(jnp.bfloat16), params["w2"].astype(jnp.bfloat16),
                preferred_element_type=jnp.float32) + params["b2"], 0.0)
    h = jnp.maximum(
        jnp.dot(h.astype(jnp.bfloat16), params["w3"].astype(jnp.bfloat16),
                preferred_element_type=jnp.float32) + params["b3"], 0.0)
    ref = jnp.sum(h * params["w4"], axis=-1, keepdims=True) + params["b4"]

    assert jnp.allclose(out, ref, atol=2e-2, rtol=2e-2), (
        float(jnp.max(jnp.abs(out - ref))))

    print("KERNEL_OK")
</pallas_src>

<mosaic_0001>
module attributes {stable_mosaic.version = 11 : i64} {
  func.func @dnn_kernel(%arg0: i32, %arg1: memref<16x3xf32, #tpu.memory_space<vmem>>, %arg2: memref<3x128xf32, #tpu.memory_space<vmem>>, %arg3: memref<1x128xf32, #tpu.memory_space<vmem>>, %arg4: memref<128x256xbf16, #tpu.memory_space<vmem>>, %arg5: memref<1x256xf32, #tpu.memory_space<vmem>>, %arg6: memref<256x128xbf16, #tpu.memory_space<vmem>>, %arg7: memref<1x128xf32, #tpu.memory_space<vmem>>, %arg8: memref<1x128xf32, #tpu.memory_space<vmem>>, %arg9: memref<1x1xf32, #tpu.memory_space<vmem>>, %arg10: memref<16x1xf32, #tpu.memory_space<vmem>>) attributes {dimension_semantics = [#tpu.dimension_semantics<parallel>], iteration_bounds = array<i64: 1>, scalar_prefetch = 0 : i64, scratch_operands = 0 : i64, tpu.core_type = #tpu.core_type<tc>, window_params = [{transform_indices = @transform_0, window_bounds = array<i64: 16, 3>}, {pipeline_mode = #tpu.pipeline_mode<synchronous>, transform_indices = @transform_1, window_bounds = array<i64: 3, 128>}, {pipeline_mode = #tpu.pipeline_mode<synchronous>, transform_indices = @transform_2, window_bounds = array<i64: 1, 128>}, {pipeline_mode = #tpu.pipeline_mode<synchronous>, transform_indices = @transform_3, window_bounds = array<i64: 128, 256>}, {pipeline_mode = #tpu.pipeline_mode<synchronous>, transform_indices = @transform_4, window_bounds = array<i64: 1, 256>}, {pipeline_mode = #tpu.pipeline_mode<synchronous>, transform_indices = @transform_5, window_bounds = array<i64: 256, 128>}, {pipeline_mode = #tpu.pipeline_mode<synchronous>, transform_indices = @transform_6, window_bounds = array<i64: 1, 128>}, {pipeline_mode = #tpu.pipeline_mode<synchronous>, transform_indices = @transform_7, window_bounds = array<i64: 1, 128>}, {pipeline_mode = #tpu.pipeline_mode<synchronous>, transform_indices = @transform_8, window_bounds = array<i64: 1, 1>}, {transform_indices = @transform_9, window_bounds = array<i64: 16, 1>}]} {
    %c0 = arith.constant 0 : index
    %c0_0 = arith.constant 0 : index
    %0 = vector.load %arg1[%c0, %c0_0] : memref<16x3xf32, #tpu.memory_space<vmem>>, vector<16x3xf32>
    %c0_1 = arith.constant 0 : index
    %c0_2 = arith.constant 0 : index
    %1 = vector.load %arg2[%c0_1, %c0_2] : memref<3x128xf32, #tpu.memory_space<vmem>>, vector<3x128xf32>
    %2 = vector.extract_strided_slice %0 {offsets = [0, 0], sizes = [16, 1], strides = [1, 1]} : vector<16x3xf32> to vector<16x1xf32>
    %3 = vector.extract_strided_slice %1 {offsets = [0, 0], sizes = [1, 128], strides = [1, 1]} : vector<3x128xf32> to vector<1x128xf32>
    %4 = vector.broadcast %2 : vector<16x1xf32> to vector<16x128xf32>
    %5 = vector.broadcast %3 : vector<1x128xf32> to vector<16x128xf32>
    %6 = arith.mulf %4, %5 : vector<16x128xf32>
    %7 = vector.extract_strided_slice %0 {offsets = [0, 1], sizes = [16, 1], strides = [1, 1]} : vector<16x3xf32> to vector<16x1xf32>
    %8 = vector.extract_strided_slice %1 {offsets = [1, 0], sizes = [1, 128], strides = [1, 1]} : vector<3x128xf32> to vector<1x128xf32>
    %9 = vector.broadcast %7 : vector<16x1xf32> to vector<16x128xf32>
    %10 = vector.broadcast %8 : vector<1x128xf32> to vector<16x128xf32>
    %11 = arith.mulf %9, %10 : vector<16x128xf32>
    %12 = arith.addf %6, %11 : vector<16x128xf32>
    %13 = vector.extract_strided_slice %0 {offsets = [0, 2], sizes = [16, 1], strides = [1, 1]} : vector<16x3xf32> to vector<16x1xf32>
    %14 = vector.extract_strided_slice %1 {offsets = [2, 0], sizes = [1, 128], strides = [1, 1]} : vector<3x128xf32> to vector<1x128xf32>
    %15 = vector.broadcast %13 : vector<16x1xf32> to vector<16x128xf32>
    %16 = vector.broadcast %14 : vector<1x128xf32> to vector<16x128xf32>
    %17 = arith.mulf %15, %16 : vector<16x128xf32>
    %18 = arith.addf %12, %17 : vector<16x128xf32>
    %c0_3 = arith.constant 0 : index
    %c0_4 = arith.constant 0 : index
    %19 = vector.load %arg3[%c0_3, %c0_4] : memref<1x128xf32, #tpu.memory_space<vmem>>, vector<1x128xf32>
    %20 = vector.broadcast %19 : vector<1x128xf32> to vector<16x128xf32>
    %21 = arith.addf %18, %20 : vector<16x128xf32>
    %cst = arith.constant 0.000000e+00 : f32
    %22 = vector.broadcast %cst : f32 to vector<16x128xf32>
    %23 = arith.maximumf %21, %22 : vector<16x128xf32>
    %24 = arith.truncf %23 : vector<16x128xf32> to vector<16x128xbf16>
    %c0_5 = arith.constant 0 : index
    %c0_6 = arith.constant 0 : index
    %25 = vector.load %arg4[%c0_5, %c0_6] : memref<128x256xbf16, #tpu.memory_space<vmem>>, vector<128x256xbf16>
    %cst_7 = arith.constant dense<0.000000e+00> : vector<16x256xf32>
    %26 = tpu.matmul %24, %25, %cst_7 {dimension_numbers = #tpu.dot_dimension_numbers<[1], [0], [0], [1], [0, 0, 1, 1], [], []>} : vector<16x128xbf16>, vector<128x256xbf16>, vector<16x256xf32> -> vector<16x256xf32>
    %c0_8 = arith.constant 0 : index
    %c0_9 = arith.constant 0 : index
    %27 = vector.load %arg5[%c0_8, %c0_9] : memref<1x256xf32, #tpu.memory_space<vmem>>, vector<1x256xf32>
    %28 = vector.broadcast %27 : vector<1x256xf32> to vector<16x256xf32>
    %29 = arith.addf %26, %28 : vector<16x256xf32>
    %cst_10 = arith.constant 0.000000e+00 : f32
    %30 = vector.broadcast %cst_10 : f32 to vector<16x256xf32>
    %31 = arith.maximumf %29, %30 : vector<16x256xf32>
    %32 = arith.truncf %31 : vector<16x256xf32> to vector<16x256xbf16>
    %c0_11 = arith.constant 0 : index
    %c0_12 = arith.constant 0 : index
    %33 = vector.load %arg6[%c0_11, %c0_12] : memref<256x128xbf16, #tpu.memory_space<vmem>>, vector<256x128xbf16>
    %cst_13 = arith.constant dense<0.000000e+00> : vector<16x128xf32>
    %34 = tpu.matmul %32, %33, %cst_13 {dimension_numbers = #tpu.dot_dimension_numbers<[1], [0], [0], [1], [0, 0, 1, 1], [], []>} : vector<16x256xbf16>, vector<256x128xbf16>, vector<16x128xf32> -> vector<16x128xf32>
    %c0_14 = arith.constant 0 : index
    %c0_15 = arith.constant 0 : index
    %35 = vector.load %arg7[%c0_14, %c0_15] : memref<1x128xf32, #tpu.memory_space<vmem>>, vector<1x128xf32>
    %36 = vector.broadcast %35 : vector<1x128xf32> to vector<16x128xf32>
    %37 = arith.addf %34, %36 : vector<16x128xf32>
    %cst_16 = arith.constant 0.000000e+00 : f32
    %38 = vector.broadcast %cst_16 : f32 to vector<16x128xf32>
    %39 = arith.maximumf %37, %38 : vector<16x128xf32>
    %c0_17 = arith.constant 0 : index
    %c0_18 = arith.constant 0 : index
    %40 = vector.load %arg8[%c0_17, %c0_18] : memref<1x128xf32, #tpu.memory_space<vmem>>, vector<1x128xf32>
    %41 = vector.broadcast %40 : vector<1x128xf32> to vector<16x128xf32>
    %42 = arith.mulf %39, %41 : vector<16x128xf32>
    %cst_19 = arith.constant dense<0.000000e+00> : vector<16xf32>
    %43 = vector.multi_reduction <add>, %42, %cst_19 [1] : vector<16x128xf32> to vector<16xf32>
    %44 = vector.shape_cast %43 : vector<16xf32> to vector<16x1xf32>
    %c0_20 = arith.constant 0 : index
    %c0_21 = arith.constant 0 : index
    %45 = vector.load %arg9[%c0_20, %c0_21] : memref<1x1xf32, #tpu.memory_space<vmem>>, vector<1x1xf32>
    %46 = vector.broadcast %45 : vector<1x1xf32> to vector<16x1xf32>
    %47 = arith.addf %44, %46 : vector<16x1xf32>
    %c0_22 = arith.constant 0 : index
    %c0_23 = arith.constant 0 : index
    %48 = vector.load %arg10[%c0_22, %c0_23] : memref<16x1xf32, #tpu.memory_space<vmem>>, vector<16x1xf32>
    tpu.vector_store %arg10[%c0_22, %c0_23], %47 {strides = array<i32>} : memref<16x1xf32, #tpu.memory_space<vmem>>, vector<16x1xf32>,
    return
  }
  func.func @transform_0(%arg0: i32) -> (i32, i32) {
    %c0_i32 = arith.constant 0 : i32
    %c0_i32_0 = arith.constant 0 : i32
    return %arg0, %c0_i32 : i32, i32
  }
  func.func @transform_1(%arg0: i32) -> (i32, i32) {
    %c0_i32 = arith.constant 0 : i32
    %c0_i32_0 = arith.constant 0 : i32
    %c0_i32_1 = arith.constant 0 : i32
    return %c0_i32, %c0_i32_0 : i32, i32
  }
  func.func @transform_2(%arg0: i32) -> (i32, i32) {
    %c0_i32 = arith.constant 0 : i32
    %c0_i32_0 = arith.constant 0 : i32
    %c0_i32_1 = arith.constant 0 : i32
    return %c0_i32, %c0_i32_0 : i32, i32
  }
  func.func @transform_3(%arg0: i32) -> (i32, i32) {
    %c0_i32 = arith.constant 0 : i32
    %c0_i32_0 = arith.constant 0 : i32
    %c0_i32_1 = arith.constant 0 : i32
    return %c0_i32, %c0_i32_0 : i32, i32
  }
  func.func @transform_4(%arg0: i32) -> (i32, i32) {
    %c0_i32 = arith.constant 0 : i32
    %c0_i32_0 = arith.constant 0 : i32
    %c0_i32_1 = arith.constant 0 : i32
    return %c0_i32, %c0_i32_0 : i32, i32
  }
  func.func @transform_5(%arg0: i32) -> (i32, i32) {
    %c0_i32 = arith.constant 0 : i32
    %c0_i32_0 = arith.constant 0 : i32
    %c0_i32_1 = arith.constant 0 : i32
    return %c0_i32, %c0_i32_0 : i32, i32
  }
  func.func @transform_6(%arg0: i32) -> (i32, i32) {
    %c0_i32 = arith.constant 0 : i32
    %c0_i32_0 = arith.constant 0 : i32
    %c0_i32_1 = arith.constant 0 : i32
    return %c0_i32, %c0_i32_0 : i32, i32
  }
  func.func @transform_7(%arg0: i32) -> (i32, i32) {
    %c0_i32 = arith.constant 0 : i32
    %c0_i32_0 = arith.constant 0 : i32
    %c0_i32_1 = arith.constant 0 : i32
    return %c0_i32, %c0_i32_0 : i32, i32
  }
  func.func @transform_8(%arg0: i32) -> (i32, i32) {
    %c0_i32 = arith.constant 0 : i32
    %c0_i32_0 = arith.constant 0 : i32
    %c0_i32_1 = arith.constant 0 : i32
    return %c0_i32, %c0_i32_0 : i32, i32
  }
  func.func @transform_9(%arg0: i32) -> (i32, i32) {
    %c0_i32 = arith.constant 0 : i32
    %c0_i32_0 = arith.constant 0 : i32
    return %arg0, %c0_i32 : i32, i32
  }
}

</mosaic_0001>

<bundles_post_ra>
// kernel: dnn_forward.1
= control target key start
LH: loop header
LB: loop body
LE: loop exit
PB: predicated region body
PF: predicated region fallthrough
CT: control target
= control target key end

     0   :  { %v567_v0 = vmov 1   ;;  %v568_v1 = vmov 0   ;;  %v569_v10 = vmov 2   ;;  %v48_v31 = vlaneseq  ;;  %s746_s0 = inlined_call_operand.vmem [shape: f32[16,3], index: 0, kind: input, shape index: {}]   ;;  %s747_s3 = inlined_call_operand.vmem [shape: bf16[128,256], index: 3, kind: input, shape index: {}]   ;;  %s748_s5 = inlined_call_operand.vmem [shape: bf16[256,128], index: 5, kind: input, shape index: {}]   ;;  %s749_s1 = inlined_call_operand.vmem [shape: f32[3,128], index: 1, kind: input, shape index: {}]   ;;  %s750_s2 = inlined_call_operand.vmem [shape: f32[1,128], index: 2, kind: input, shape index: {}]   ;;  %s751_s4 = inlined_call_operand.vmem [shape: f32[1,256], index: 4, kind: input, shape index: {}]   ;;  %s752_s8 = inlined_call_operand.<no memory space> [shape: f32[1,1], index: 8, kind: input, shape index: {}]   ;;  %s753_s6 = inlined_call_operand.vmem [shape: f32[1,128], index: 6, kind: input, shape index: {}]   ;;  %s754_s7 = inlined_call_operand.vmem [shape: f32[1,128], index: 7, kind: input, shape index: {}]   ;;  %s755_s9 = inlined_call_operand.vmem [shape: f32[16,1], index: 9, kind: output, shape index: {}]  }
   0x1   :  { %524 = vset.pattern.permute.xlu1 %v567_v0  ;;  %523 = vset.pattern.permute.xlu0 %v568_v1  ;;  %v35_v2 = vld [vmem:[%s746_s0] sm:$0xff]  ;;  %v36_v3 = vld [vmem:[%s746_s0 + $0x8] sm:$0xff]  ;;  %v527_v4 = vld [vmem:[%s747_s3 + $0x74] ss:$8 sps:$4 sm:$0xff]   ;;  %vm455_vm0 = vcmask 7168  }
   0x2   :  { %55 = vperm.xlu1 %524, %v35_v2   ;;  %40 = vperm.xlu0 %523, %v35_v2   ;;  %v529_v5 = vld [vmem:[%s747_s3 + $0x70] ss:$8 sps:$4 sm:$0xff]   ;;  %v530_v6 = vld [vmem:[%s747_s3 + $0x64] ss:$8 sps:$4 sm:$0xff]   ;;  %v532_v7 = vld [vmem:[%s747_s3 + $0x60] ss:$8 sps:$4 sm:$0xff]  }
   0x3   :  { %238 = vmatprep.mubr.bf16.mxu0 %v568_v1  ;;  %206 = vmatprep.subr.bf16.mxu0 %v527_v4  ;;  %v533_v8 = vld [vmem:[%s747_s3 + $0x54] ss:$8 sps:$4 sm:$0xff]   ;;  %v535_v9 = vld [vmem:[%s747_s3 + $0x50] ss:$8 sps:$4 sm:$0xff]   ;;  %v536_v11 = vld [vmem:[%s747_s3 + $0x44] ss:$8 sps:$4 sm:$0xff]  }
   0x4   :  { %207 = vmatpush1.bf16.msra.mxu0 %v529_v5  ;;  %v538_v12 = vld [vmem:[%s747_s3 + $0x40] ss:$8 sps:$4 sm:$0xff]   ;;  %v539_v13 = vld [vmem:[%s747_s3 + $0x34] ss:$8 sps:$4 sm:$0xff]   ;;  %v541_v14 = vld [vmem:[%s747_s3 + $0x30] ss:$8 sps:$4 sm:$0xff]  }
   0x5   :  { %208 = vmatprep.subr.bf16.mxu0 %v530_v6  ;;  %v542_v15 = vld [vmem:[%s747_s3 + $0x24] ss:$8 sps:$4 sm:$0xff]   ;;  %v551_v16 = vld [vmem:[%s748_s5 + $0x78] sm:$0xff]   ;;  %v544_v17 = vld [vmem:[%s747_s3 + $0x20] ss:$8 sps:$4 sm:$0xff]   ;;  %v49_v32 = vshrl.u32 %v48_v31, 7 }
   0x6   :  { %59 = vperm.xlu1 %524, %v36_v3   ;;  %45 = vperm.xlu0 %523, %v36_v3   ;;  %v552_v18 = vld [vmem:[%s748_s5 + $0x38] sm:$0xff]   ;;  %v553_v20 = vld [vmem:[%s748_s5 + $0x70] sm:$0xff]   ;;  %v555_v22 = vld [vmem:[%s748_s5 + $0x68] sm:$0xff]  }
   0x7   :  { %v545_v19 = vld [vmem:[%s747_s3 + $0x14] ss:$8 sps:$4 sm:$0xff]   ;;  %498 = vmatprep.subr.bf16.mxu1 %v551_v16  ;;  %v547_v23 = vld [vmem:[%s747_s3 + $0x10] ss:$8 sps:$4 sm:$0xff]   ;;  %v548_v24 = vld [vmem:[%s747_s3 + $0x4] ss:$8 sps:$4 sm:$0xff]  }
   0x8   :  { %209 = vmatpush1.bf16.msra.mxu0 %v532_v7  ;;  %499 = vmatpush3.bf16.msra.mxu1 %v552_v18  ;;  %v554_v21 = vld [vmem:[%s748_s5 + $0x30] sm:$0xff]   ;;  %v556_v25 = vld [vmem:[%s748_s5 + $0x28] sm:$0xff]   ;;  %v557_v26 = vld [vmem:[%s748_s5 + $0x60] sm:$0xff]   ;;  %v64_v33 = vsub.s32 1, %v49_v32  ;;  %v50_v34 = vsub.s32 0, %v49_v32  ;;  %v80_v38 = vsub.s32 2, %v49_v32 }
   0x9   :  { %210 = vmatprep.subr.bf16.mxu0 %v533_v8  ;;  %500 = vmatprep.subr.bf16.mxu1 %v553_v20  ;;  %v550_v27 = vld [vmem:[%s747_s3] ss:$8 sps:$4 sm:$0xff]   ;;  %v559_v29 = vld [vmem:[%s748_s5 + $0x58] sm:$0xff]   ;;  %v561_v62 = vld [vmem:[%s748_s5 + $0x50] sm:$0xff]  }
   0xa   :  { %526 = vset.pattern.permute.xlu1 %v569_v10  ;;  %525 = vset.pattern.permute.xlu0 %v569_v10  ;;  %v558_v28 = vld [vmem:[%s748_s5 + $0x20] sm:$0xff]   ;;  %v560_v30 = vld [vmem:[%s748_s5 + $0x18] sm:$0xff]   ;;  %v562_v63 = vld [vmem:[%s748_s5 + $0x10] sm:$0xff]  }
   0xb   :  { %75 = vperm.xlu1 %526, %v36_v3   ;;  %71 = vperm.xlu0 %525, %v35_v2   ;;  %v37_v35 = vld [vmem:[%s749_s1] sm:$0x7]  ;;  %v563_v0 = vld [vmem:[%s748_s5 + $0x48] sm:$0xff]  }
   0xc   :  { %211 = vmatpush1.bf16.msra.mxu0 %v535_v9  ;;  %501 = vmatpush3.bf16.msra.mxu1 %v554_v21  ;;  %v65_v39 = vrot.slane %v37_v35, %v64_v33  ;;  %v51_v40 = vrot.slane %v37_v35, %v50_v34  ;;  %v81_v43 = vrot.slane %v37_v35, %v80_v38  ;;  %v462_v54 = vld [vmem:[%s750_s2] ss:$0 sm:$0xff]  ;;  %v564_v1 = vld [vmem:[%s748_s5 + $0x8] sm:$0xff]   ;;  %v14_v21 = vstv %s752_s8 }
   0xd   :  { %212 = vmatprep.subr.bf16.mxu0 %v536_v11  ;;  %502 = vmatprep.subr.bf16.mxu1 %v555_v22  ;;  %v565_v2 = vld [vmem:[%s748_s5 + $0x40] sm:$0xff]   ;;  %15 = vst [vmem:[#allocation2] sm:$0x1] %v14_v21 }
   0xe   :  { %v566_v3 = vld [vmem:[%s748_s5] sm:$0xff]  }
   0xf   :  { %v114_v4 = vld [vmem:[%s751_s4] sm:$0x3] }
  0x10   :  { %213 = vmatpush1.bf16.msra.mxu0 %v538_v12  ;;  %503 = vmatpush3.bf16.msra.mxu1 %v556_v25  ;;  %v123_v6 = vrot.slane %v114_v4, %v64_v33  ;;  %v119_v7 = vrot.slane %v114_v4, %v50_v34 }
  0x11   :  { %214 = vmatprep.subr.bf16.mxu0 %v539_v13  ;;  %504 = vmatprep.subr.bf16.mxu1 %v557_v26 }
  0x14   :  { %215 = vmatpush1.bf16.msra.mxu0 %v541_v14  ;;  %505 = vmatpush3.bf16.msra.mxu1 %v558_v28 }
  0x15   :  { %216 = vmatprep.subr.bf16.mxu0 %v542_v15  ;;  %506 = vmatprep.subr.bf16.mxu1 %v559_v29  ;;  %v496_v29 = vld [vmem:[%s754_s7] ss:$0 sm:$0xff] }
  0x18   :  { %217 = vmatpush1.bf16.msra.mxu0 %v544_v17  ;;  %507 = vmatpush3.bf16.msra.mxu1 %v560_v30 }
  0x19   :  { %218 = vmatprep.subr.bf16.mxu0 %v545_v19  ;;  %508 = vmatprep.subr.bf16.mxu1 %v561_v62 }
  0x1c   :  { %219 = vmatpush1.bf16.msra.mxu0 %v547_v23  ;;  %509 = vmatpush3.bf16.msra.mxu1 %v562_v63  ;;  %v479_v23 = vld [vmem:[%s753_s6] ss:$0 sm:$0xff] }
  0x1d   :  { %220 = vmatprep.subr.bf16.mxu0 %v548_v24  ;;  %510 = vmatprep.subr.bf16.mxu1 %v563_v0 }
  0x20   :  { %221 = vmatpush1.bf16.msra.mxu0 %v550_v27  ;;  %511 = vmatpush3.bf16.msra.mxu1 %v564_v1 }
  0x21   :  { %512 = vmatprep.subr.bf16.mxu1 %v565_v2 }
  0x24   :  { %513 = vmatpush3.bf16.msra.mxu1 %v566_v3 }
  0x7d   :  { %v56_v36 = vpop.permute.xlu1 %55  ;;  %v41_v37 = vpop.permute.xlu0 %40 }
  0x7e   :  { %v66_v44 = vmul.f32 %v65_v39, %v56_v36  ;;  %v52_v45 = vmul.f32 %v51_v40, %v41_v37  ;;  %v497_v36 = vld [vmem:[#allocation2] ss:$0 sm:$0xff] }
  0x80   :  { %v68_v50 = vadd.f32 %v66_v44, %v52_v45 }
  0x81   :  { %v60_v41 = vpop.permute.xlu1 %59  ;;  %v46_v42 = vpop.permute.xlu0 %45 }
  0x82   :  { %v67_v46 = vmul.f32 %v65_v39, %v60_v41  ;;  %v53_v47 = vmul.f32 %v51_v40, %v46_v42 }
  0x84   :  { %v69_v51 = vadd.f32 %v67_v46, %v53_v47 }
  0x86   :  { %v76_v48 = vpop.permute.xlu1 %75  ;;  %v72_v49 = vpop.permute.xlu0 %71 }
  0x87   :  { %v83_v52 = vmul.f32 %v81_v43, %v76_v48  ;;  %v82_v53 = vmul.f32 %v81_v43, %v72_v49 }
  0x89   :  { %v85_v55 = vadd.f32 %v83_v52, %v69_v51  ;;  %v84_v56 = vadd.f32 %v82_v53, %v68_v50 }
  0x8b   :  { %v94_v57 = vadd.f32 %v462_v54, %v85_v55  ;;  %v93_v58 = vadd.f32 %v462_v54, %v84_v56 }
  0x8d   :  { %v96_v59 = vmax.f32 %v94_v57, 0.0  ;;  %v95_v60 = vmax.f32 %v93_v58, 0.0 }
  0x8f   :  { %v97_v61 = vpack.c.bf16 %v96_v59, %v95_v60 }
  0x91   :  { %239 = vmatmul.mubr.bf16.vlgmr.msra.gmra.mxu0 %v97_v61 }
 0x151   :  { %v240_v5 = vpop.f32.mrf.mxu0 }
 0x152   :  { %v241_v12 = vadd.f32 %v240_v5, %v119_v7 }
 0x153   :  { %v242_v8 = vpop.f32.mrf.mxu0 }
 0x154   :  { %v243_v10 = vadd.f32 %v242_v8, %v123_v6  ;;  %v249_v18 = vmax.f32 %v241_v12, 0.0 }
 0x155   :  { %v244_v9 = vpop.f32.mrf.mxu0 }
 0x156   :  { %v245_v11 = vadd.f32 %v244_v9, %v119_v7  ;;  %v250_v16 = vmax.f32 %v243_v10, 0.0 }
 0x157   :  { %v246_v13 = vpop.f32.mrf.mxu0 }
 0x158   :  { %v247_v14 = vadd.f32 %v246_v13, %v123_v6  ;;  %v251_v15 = vmax.f32 %v245_v11, 0.0 }
 0x15a   :  { %v252_v17 = vmax.f32 %v247_v14, 0.0  ;;  %v253_v20 = vpack.c.bf16 %v251_v15, %v249_v18 }
 0x15c   :  { %v254_v19 = vpack.c.bf16 %v252_v17, %v250_v16 }
 0x15e   :  { %422 = vmatprep.mubr.bf16.mxu1 %v254_v19 }
 0x15f   :  { %423 = vmatmul.mubr.bf16.vlgmr.msra.gmra.mxu1 %v253_v20 }
 0x21f   :  { %v514_v22 = vpop.f32.mrf.mxu1 }
 0x221   :  { %v515_v24 = vpop.f32.mrf.mxu1 }
 0x222   :  { %v516_v25 = vadd.f32 %v515_v24, %v514_v22 }
 0x223   :  { %v517_v26 = vpop.f32.mrf.mxu1 }
 0x224   :  { %v425_v27 = vadd.f32 %v516_v25, %v479_v23 }
 0x225   :  { %v518_v28 = vpop.f32.mrf.mxu1 }
 0x226   :  { %v431_v30 = vmax.f32 %v425_v27, 0.0  ;;  %v519_v31 = vadd.f32 %v518_v28, %v517_v26 }
 0x228   :  { %v428_v32 = vadd.f32 %v519_v31, %v479_v23  ;;  %v440_v33 = vmul.f32 %v496_v29, %v431_v30 }
 0x22a   :  { %v432_v34 = vmax.f32 %v428_v32, 0.0  ;;  %442 = vadd.xlane.f32.xlu1 %v440_v33 }
 0x22c   :  { %v441_v35 = vmul.f32 %v496_v29, %v432_v34 }
 0x22e   :  { %444 = vadd.xlane.f32.xlu0 %v441_v35 }
 0x2b3   :  { %v443_v37 = vpop.xlane.xlu1 %442 }
 0x2b4   :  { %v453_v38 = vadd.f32 %v497_v36, %v443_v37 }
 0x2b6   :  { %456 = vst.msk [vmem:[%s755_s9] sm:$0xff] %vm455_vm0, %v453_v38 }
 0x2b7   :  { %v445_v39 = vpop.xlane.xlu0 %444 }
 0x2b8   :  { %v454_v40 = vadd.f32 %v497_v36, %v445_v39 }
 0x2ba   :  { %457 = vst.msk [vmem:[%s755_s9 + $0x8] sm:$0xff] %vm455_vm0, %v454_v40 }

</bundles_post_ra>
